<compile_context>
chip_gen: v5e
topology: v5e:2x2
jax: 0.10.0
libtpu: 0.0.40
codegen_flags: <defaults>
</compile_context>

<pallas_src>
import jax
import jax.numpy as jnp
from jax.experimental import pallas as pl
from jax.experimental.pallas import tpu as pltpu


def _round_up(a, b):
    return (a + b - 1) // b * b


def _sublanes(dtype):
    # Sub-32-bit dtypes pack along sublanes: f32 -> 8, bf16 -> 16, int8 -> 32.
    return max(8, 32 // jnp.dtype(dtype).itemsize)


# ----------------------------- kernels --------------------------------------


def _conv1x1_vpu_kernel(w_ref, x_ref, o_ref):
    """Small-C path: C^2 broadcast-FMAs on the VPU.

    w_ref: (C, C) float32, resident across the whole grid.
    x_ref: (C, T)  input dtype, lane-dense spatial tile.
    o_ref: (C, T)
    """
    x = x_ref[...]
    w = w_ref[...]
    c = x.shape[0]
    # out[o, t] = sum_c W[o, c] * x[c, t]; f32 accumulation via dtype promotion.
    acc = w[:, 0:1] * x[0:1, :]          # (C,1) * (1,T) -> (C,T) f32
    for k in range(1, c):
        acc = acc + w[:, k:k + 1] * x[k:k + 1, :]
    o_ref[...] = acc.astype(o_ref.dtype)


def _conv1x1_mxu_kernel(w_ref, x_ref, o_ref):
    """MXU path: native-dtype operands, f32 accumulation.

    w_ref: (To, C) in x's dtype (output-channel block of the weight).
    x_ref: (C, T); o_ref: (To, T).
    """
    o_ref[...] = jnp.dot(
        w_ref[...], x_ref[...], preferred_element_type=jnp.float32
    ).astype(o_ref.dtype)


# ----------------------------- wrapper ---------------------------------------


def _pick_spatial_tile(hw, per_lane_bytes, budget_bytes):
    """Largest 128-lane-aligned spatial tile whose working set fits the budget."""
    if hw <= 128:
        return hw                       # single full-extent block (always legal)
    max_cols = max(1, budget_bytes // (per_lane_bytes * 128))
    tile = min((hw // 128) * 128, max_cols * 128)
    return max(128, tile)


@jax.jit
def invertible_1x1_conv(x, weight):
    """x: (B, C, H, W); weight: (C, C, 1, 1) (PyTorch conv layout). Returns NCHW."""
    B, C, H, W = x.shape
    hw = H * W
    w2d = weight.reshape(C, C)
    x3 = x.reshape(B, C, hw)            # zero-cost row-major view; hw is the lane axis

    in_dt = x.dtype
    in_is = jnp.dtype(in_dt).itemsize
    c_pad_in = _round_up(C, _sublanes(in_dt))

    use_vpu = C <= 16                   # tiny channel count: skip the MXU entirely

    # Generation-aware VMEM budget (128 MiB on v5e/v6e, 64 MiB on v7x).
    try:
        vmem_cap = pltpu.get_tpu_info().vmem_capacity_bytes
    except Exception:                   # pragma: no cover - conservative fallback
        vmem_cap = 64 << 20
    budget = vmem_cap // 4              # per-step working-set budget for tile picking
    limit_cap = min(vmem_cap // 2, 64 << 20)

    if use_vpu:
        tile_o, n_oblk = C, 1
    else:
        tile_o = C if C <= 256 else 256
        n_oblk = pl.cdiv(C, tile_o)

    c_pad_out = _round_up(min(tile_o, C), _sublanes(in_dt))
    acc_rows = _round_up(min(tile_o, C), 8)     # f32 accumulator sublane footprint

    # Bytes per single lane column of the per-step working set
    # (sublane-padded, double-buffered x and out blocks + f32 intermediate).
    per_lane = (2 * c_pad_in * in_is
                + 2 * c_pad_out * in_is
                + acc_rows * 4)
    tile = _pick_spatial_tile(hw, per_lane, budget)
    n_spatial = pl.cdiv(hw, tile)

    # Guarantee >= 2 parallel grid steps so both v7x TensorCores get work.
    if B * n_spatial * n_oblk < 2 and hw > 128:
        tile = _round_up(pl.cdiv(hw, 2), 128)
        n_spatial = pl.cdiv(hw, tile)

    w_bytes = 2 * _round_up(C, 8) * _round_up(C, 128) * 4
    working_set = per_lane * tile + w_bytes
    vmem_limit = int(min(limit_cap, max(working_set + (4 << 20), 16 << 20)))

    cost = pl.CostEstimate(
        flops=2 * B * C * C * hw,
        transcendentals=0,
        bytes_accessed=2 * B * C * hw * in_is + C * C * 4,
    )

    if use_vpu:
        grid = (B, n_spatial)
        in_specs = [
            pl.BlockSpec((C, C), lambda b, j: (0, 0)),              # weight, resident
            pl.BlockSpec((None, C, tile), lambda b, j: (b, 0, j)),  # x spatial tile
        ]
        out_specs = pl.BlockSpec((None, C, tile), lambda b, j: (b, 0, j))
        kernel = _conv1x1_vpu_kernel
        w_arg = w2d.astype(jnp.float32)                 # f32 accumulation on the VPU
        semantics = ("parallel", "parallel")
    else:
        # o-block axis innermost: x tile stays resident across output-channel blocks.
        grid = (B, n_spatial, n_oblk)
        in_specs = [
            pl.BlockSpec((tile_o, C), lambda b, j, o: (o, 0)),
            pl.BlockSpec((None, C, tile), lambda b, j, o: (b, 0, j)),
        ]
        out_specs = pl.BlockSpec((None, tile_o, tile), lambda b, j, o: (b, o, j))
        kernel = _conv1x1_mxu_kernel
        w_arg = w2d.astype(in_dt)       # native-rate MXU operands, f32 accumulate
        semantics = ("parallel", "parallel", "arbitrary")

    out = pl.pallas_call(
        kernel,
        out_shape=jax.ShapeDtypeStruct((B, C, hw), in_dt),
        grid_spec=pl.GridSpec(grid=grid, in_specs=in_specs, out_specs=out_specs),
        compiler_params=pltpu.CompilerParams(
            dimension_semantics=semantics,
            vmem_limit_bytes=vmem_limit,
        ),
        cost_estimate=cost,
    )(w_arg, x3)
    return out.reshape(B, C, H, W)


if __name__ == "__main__":
    B, C, H, W = 2, 4, 16, 16
    key = jax.random.PRNGKey(0)
    k_x, k_w = jax.random.split(key)
    x = jax.random.normal(k_x, (B, C, H, W), jnp.float32)

    # 1) Module's default parameter: identity weight -> output must equal input.
    w_eye = jnp.eye(C, dtype=jnp.float32)[:, :, None, None]
    out_eye = jax.block_until_ready(invertible_1x1_conv(x, w_eye))
    assert out_eye.shape == (B, C, H, W)
    assert jnp.allclose(out_eye, x, atol=1e-5, rtol=1e-5), "identity-weight mismatch"

    # 2) A non-trivial (trained-like) weight to exercise the channel mixing.
    w_rand = jax.random.normal(k_w, (C, C), jnp.float32)[:, :, None, None]
    out = jax.block_until_ready(invertible_1x1_conv(x, w_rand))
    ref = jnp.einsum("oc,bchw->bohw", w_rand[:, :, 0, 0], x)
    assert jnp.allclose(out, ref, atol=1e-4, rtol=1e-4), "mismatch vs reference"

    # 3) bf16 activations: no in-kernel f32 upcast of x, f32 accumulation.
    x_bf16 = x.astype(jnp.bfloat16)
    out_bf16 = jax.block_until_ready(invertible_1x1_conv(x_bf16, w_rand))
    ref_bf16 = jnp.einsum(
        "oc,bchw->bohw", w_rand[:, :, 0, 0], x_bf16.astype(jnp.float32)
    )
    assert out_bf16.dtype == jnp.bfloat16
    assert jnp.allclose(
        out_bf16.astype(jnp.float32), ref_bf16, atol=5e-2, rtol=5e-2
    ), "bf16 mismatch vs reference"

    print("KERNEL_OK")
</pallas_src>

<mosaic_0001>
module attributes {stable_mosaic.version = 11 : i64} {
  func.func @_conv1x1_vpu_kernel(%arg0: i32, %arg1: i32, %arg2: memref<4x4xf32, #tpu.memory_space<vmem>>, %arg3: memref<1x4x256xf32, #tpu.memory_space<vmem>>, %arg4: memref<1x4x256xf32, #tpu.memory_space<vmem>>) attributes {dimension_semantics = [#tpu.dimension_semantics<parallel>, #tpu.dimension_semantics<parallel>], iteration_bounds = array<i64: 2, 1>, scalar_prefetch = 0 : i64, scratch_operands = 0 : i64, tpu.core_type = #tpu.core_type<tc>, window_params = [{pipeline_mode = #tpu.pipeline_mode<synchronous>, transform_indices = @transform_0, window_bounds = array<i64: 4, 4>}, {transform_indices = @transform_1, window_bounds = array<i64: 1, 4, 256>}, {transform_indices = @transform_2, window_bounds = array<i64: 1, 4, 256>}]} {
    %c0 = arith.constant 0 : index
    %c0_0 = arith.constant 0 : index
    %c0_1 = arith.constant 0 : index
    %0 = vector.load %arg3[%c0, %c0_0, %c0_1] : memref<1x4x256xf32, #tpu.memory_space<vmem>>, vector<1x4x256xf32>
    %1 = vector.shape_cast %0 : vector<1x4x256xf32> to vector<4x256xf32>
    %c0_2 = arith.constant 0 : index
    %c0_3 = arith.constant 0 : index
    %2 = vector.load %arg2[%c0_2, %c0_3] : memref<4x4xf32, #tpu.memory_space<vmem>>, vector<4x4xf32>
    %3 = vector.extract_strided_slice %2 {offsets = [0, 0], sizes = [4, 1], strides = [1, 1]} : vector<4x4xf32> to vector<4x1xf32>
    %4 = vector.extract_strided_slice %1 {offsets = [0, 0], sizes = [1, 256], strides = [1, 1]} : vector<4x256xf32> to vector<1x256xf32>
    %5 = vector.broadcast %3 : vector<4x1xf32> to vector<4x256xf32>
    %6 = vector.broadcast %4 : vector<1x256xf32> to vector<4x256xf32>
    %7 = arith.mulf %5, %6 : vector<4x256xf32>
    %8 = vector.extract_strided_slice %2 {offsets = [0, 1], sizes = [4, 1], strides = [1, 1]} : vector<4x4xf32> to vector<4x1xf32>
    %9 = vector.extract_strided_slice %1 {offsets = [1, 0], sizes = [1, 256], strides = [1, 1]} : vector<4x256xf32> to vector<1x256xf32>
    %10 = vector.broadcast %8 : vector<4x1xf32> to vector<4x256xf32>
    %11 = vector.broadcast %9 : vector<1x256xf32> to vector<4x256xf32>
    %12 = arith.mulf %10, %11 : vector<4x256xf32>
    %13 = arith.addf %7, %12 : vector<4x256xf32>
    %14 = vector.extract_strided_slice %2 {offsets = [0, 2], sizes = [4, 1], strides = [1, 1]} : vector<4x4xf32> to vector<4x1xf32>
    %15 = vector.extract_strided_slice %1 {offsets = [2, 0], sizes = [1, 256], strides = [1, 1]} : vector<4x256xf32> to vector<1x256xf32>
    %16 = vector.broadcast %14 : vector<4x1xf32> to vector<4x256xf32>
    %17 = vector.broadcast %15 : vector<1x256xf32> to vector<4x256xf32>
    %18 = arith.mulf %16, %17 : vector<4x256xf32>
    %19 = arith.addf %13, %18 : vector<4x256xf32>
    %20 = vector.extract_strided_slice %2 {offsets = [0, 3], sizes = [4, 1], strides = [1, 1]} : vector<4x4xf32> to vector<4x1xf32>
    %21 = vector.extract_strided_slice %1 {offsets = [3, 0], sizes = [1, 256], strides = [1, 1]} : vector<4x256xf32> to vector<1x256xf32>
    %22 = vector.broadcast %20 : vector<4x1xf32> to vector<4x256xf32>
    %23 = vector.broadcast %21 : vector<1x256xf32> to vector<4x256xf32>
    %24 = arith.mulf %22, %23 : vector<4x256xf32>
    %25 = arith.addf %19, %24 : vector<4x256xf32>
    %c0_4 = arith.constant 0 : index
    %c0_5 = arith.constant 0 : index
    %c0_6 = arith.constant 0 : index
    %26 = vector.load %arg4[%c0_4, %c0_5, %c0_6] : memref<1x4x256xf32, #tpu.memory_space<vmem>>, vector<1x4x256xf32>
    %27 = vector.shape_cast %26 : vector<1x4x256xf32> to vector<4x256xf32>
    %28 = vector.shape_cast %25 : vector<4x256xf32> to vector<1x4x256xf32>
    tpu.vector_store %arg4[%c0_4, %c0_5, %c0_6], %28 {strides = array<i32>} : memref<1x4x256xf32, #tpu.memory_space<vmem>>, vector<1x4x256xf32>,
    return
  }
  func.func @transform_0(%arg0: i32, %arg1: i32) -> (i32, i32) {
    %c0_i32 = arith.constant 0 : i32
    %c0_i32_0 = arith.constant 0 : i32
    %c0_i32_1 = arith.constant 0 : i32
    return %c0_i32, %c0_i32_0 : i32, i32
  }
  func.func @transform_1(%arg0: i32, %arg1: i32) -> (i32, i32, i32) {
    %c0_i32 = arith.constant 0 : i32
    %c0_i32_0 = arith.constant 0 : i32
    return %arg0, %c0_i32, %arg1 : i32, i32, i32
  }
  func.func @transform_2(%arg0: i32, %arg1: i32) -> (i32, i32, i32) {
    %c0_i32 = arith.constant 0 : i32
    %c0_i32_0 = arith.constant 0 : i32
    return %arg0, %c0_i32, %arg1 : i32, i32, i32
  }
}

</mosaic_0001>

<bundles_post_ra>
// kernel: invertible_1x1_conv.1
= control target key start
LH: loop header
LB: loop body
LE: loop exit
PB: predicated region body
PF: predicated region fallthrough
CT: control target
= control target key end

     0   :  { %s424_s9 = smov 0   ;;  %s426_s10 = smov 0   ;;  %s467_s0 = inlined_call_operand.vmem [shape: f32[4,4], index: 0, kind: input, shape index: {}]   ;;  %s468_s1 = inlined_call_operand.vmem [shape: f32[2,4,256], index: 1, kind: input, shape index: {}]   ;;  %s469_s2 = inlined_call_operand.vmem [shape: f32[2,4,256], index: 2, kind: output, shape index: {}]  }
   0x1   :  { %s428_s11 = smov 0  }
   0x2 LB: > { %s24_s12 = sadd.s32 1, %s399_s10  ;;  %p339_p0 = scmp.ge.s32.totalorder %s403_s11, 1  ;;  %s403_s11 = sphi %s428_s11, %s12_s11   ;;  %s399_s10 = sphi %s426_s10, %s471_s10   ;;  %s395_s9 = sphi %s424_s9, %s470_s9  }
   0x3   : > { %p26_p1 = scmp.ge.s32.totalorder %s24_s12, 2  ;;  %p133_p2 = scmp.lt.s32.totalorder %s403_s11, 3 }
   0x5   : > { %s473_s12 = smov (%p26_p1, %s24_s12), 0  ;;  %p134_p3 = pnand %p339_p0, %p133_p2 }
   0x6   : > { %p164_p4 = scmp.lt.s32.totalorder (!%p134_p3), %s395_s9, 1 }
   0x7   : > { %137 = sbr.rel (%p134_p3) target bundleno = 150 (0x96), region = 28 }
   0xc   : > { %v184_v0 = vld [vmem:[%s467_s0] sm:$0xf]  ;;  %v405_v1 = vmov 0   ;;  %v406_v2 = vmov 2   ;;  %v407_v3 = vmov 1   ;;  %v408_v4 = vmov 3  }
   0xd   : > { %376 = vset.pattern.permute.xlu0 %v405_v1  ;;  %378 = vset.pattern.permute.xlu1 %v406_v2  ;;  %s475_s9 = smov (!%p164_p4, %s395_s9), 1  ;;  %vm244_vm0 = vcmask 1043456  }
   0xe   : > { %187 = vperm.xlu0 %376, %v184_v0   ;;  %214 = vperm.xlu1 %378, %v184_v0   ;;  %s346_s15 = sshll.u32 %s475_s9, 3 }
   0xf   : > { %s171_s18 = scalar_lea.vmem %s468_s1, %s346_s15  ;;  %s181_s21 = scalar_lea.vmem %s469_s2, %s346_s15 }
  0x10   : > { %v183_v5 = vld [vmem:[%s171_s18] sm:$0xff] }
  0x11   : > { %v191_v8 = vperm.slane %v183_v5, 0  ;;  %v192_v9 = vperm.slane %v183_v5, 4  ;;  %v203_v10 = vperm.slane %v183_v5, 1  ;;  %v204_v11 = vperm.slane %v183_v5, 5 }
  0x12   : > { %v217_v12 = vperm.slane %v183_v5, 2  ;;  %v218_v13 = vperm.slane %v183_v5, 6  ;;  %v232_v14 = vperm.slane %v183_v5, 7  ;;  %v231_v15 = vperm.slane %v183_v5, 3 }
  0x13   : > { %v195_v16 = vperm.slane %v191_v8, 0  ;;  %v196_v17 = vperm.slane %v192_v9, 0  ;;  %v207_v18 = vperm.slane %v203_v10, 1  ;;  %v208_v19 = vperm.slane %v204_v11, 1 }
  0x14   : > { %v221_v20 = vperm.slane %v217_v12, 2  ;;  %v222_v21 = vperm.slane %v218_v13, 2  ;;  %v236_v22 = vperm.slane %v232_v14, 3  ;;  %v235_v25 = vperm.slane %v231_v15, 3 }
  0x16   : > { %377 = vset.pattern.permute.xlu0 %v407_v3  ;;  %379 = vset.pattern.permute.xlu1 %v408_v4 }
  0x17   : > { %200 = vperm.xlu0 %377, %v184_v0   ;;  %228 = vperm.xlu1 %379, %v184_v0  }
  0x1f   : > { %380 = vset.pattern.permute.xlu0 %v408_v4 }
  0x80   : > { %v188_v6 = vpop.permute.xlu0 %187  ;;  %v215_v7 = vpop.permute.xlu1 %214 }
  0x81   : > { %v197_v26 = vmul.f32 %v195_v16, %v188_v6  ;;  %v198_v27 = vmul.f32 %v196_v17, %v188_v6  ;;  %v223_v30 = vmul.f32 %v221_v20, %v215_v7  ;;  %v224_v31 = vmul.f32 %v222_v21, %v215_v7 }
  0x89   : > { %v201_v23 = vpop.permute.xlu0 %200  ;;  %v229_v24 = vpop.permute.xlu1 %228 }
  0x8a   : > { %v209_v28 = vmul.f32 %v207_v18, %v201_v23  ;;  %v210_v29 = vmul.f32 %v208_v19, %v201_v23  ;;  %v238_v34 = vmul.f32 %v236_v22, %v229_v24  ;;  %v237_v37 = vmul.f32 %v235_v25, %v229_v24 }
  0x8c   : > { %v211_v32 = vadd.f32 %v209_v28, %v197_v26  ;;  %v212_v33 = vadd.f32 %v210_v29, %v198_v27 }
  0x8e   : > { %v225_v35 = vadd.f32 %v223_v30, %v211_v32  ;;  %v226_v36 = vadd.f32 %v224_v31, %v212_v33 }
  0x90   : > { %v240_v38 = vadd.f32 %v238_v34, %v226_v36  ;;  %v239_v39 = vadd.f32 %v237_v37, %v225_v35 }
  0x92   : > { %v243_v40 = vrot.slane %v240_v38, 4 }
  0x94   : > { %v245_v41 = vsel %vm244_vm0, %v239_v39, %v243_v40 }
  0x95   : > { %247 = vst [vmem:[%s181_s21] sm:$0xff] %v245_v41 }
  0x96 PF: > { %s12_s11 = sadd.s32 1, %s403_s11   ;;  %s470_s9 = smov %s399_s10 }
  0x97   : > { %p9_p5 = scmp.ge.s32.totalorder %s12_s11, 4   ;;  %s471_s10 = smov %s473_s12 }
  0x99   :  { %11 = sbr.rel (!%p9_p5) target bundleno = 2 (0x2), region = 58 }

</bundles_post_ra>
